<compile_context>
chip_gen: v6e
topology: v6e:2x2x1
jax: 0.10.0
libtpu: 0.0.40
codegen_flags: <defaults>
</compile_context>

<pallas_src>
import functools
import math

import jax
import jax.numpy as jnp
from jax import lax
from jax.experimental import pallas as pl
from jax.experimental.pallas import tpu as pltpu


# ---------------------------------------------------------------------------
# Kernel
# ---------------------------------------------------------------------------
def _conv1d_k3_relu(h, w_ref, b_ref, compute_dtype):
    """h: (Cin, S) f32 (seq on lanes). w_ref: (Cout, 3*Cin) compute_dtype,
    column index = k*Cin + cin. b_ref: (Cout, 1) f32. Returns (Cout, S) f32."""
    C, S = h.shape
    zero_col = jnp.zeros((C, 1), dtype=h.dtype)
    # zero-padded (C, S+2); padding=1 semantics of the torch Conv1d
    hpad = jnp.concatenate([zero_col, h, zero_col], axis=1)
    # Stack k=0 (prev), k=1 (cur), k=2 (next) taps along the channel/sublane
    # axis -> one fused matmul with K = 3*Cin instead of three tiny-K matmuls.
    hcat = jnp.concatenate([hpad[:, 0:S], h, hpad[:, 2:S + 2]], axis=0)  # (3C, S)
    y = jnp.dot(w_ref[...], hcat.astype(compute_dtype),
                preferred_element_type=jnp.float32)                      # (Cout, S)
    y = y + b_ref[...]            # (Cout, 1) broadcast over lanes
    return jnp.maximum(y, 0.0)


def feature_extractor_kernel(x_ref,
                             w1_ref, b1_ref,
                             w2_ref, b2_ref,
                             w3_ref, b3_ref,
                             o_ref,
                             *, compute_dtype):
    x = x_ref[0].astype(jnp.float32)                              # (Cin, S)
    h1 = _conv1d_k3_relu(x, w1_ref, b1_ref, compute_dtype)        # (16, S)
    h2 = _conv1d_k3_relu(h1, w2_ref, b2_ref, compute_dtype)       # (32, S)
    h3 = _conv1d_k3_relu(h2, w3_ref, b3_ref, compute_dtype)       # (64, S)
    inv_s = jnp.float32(1.0 / x.shape[1])
    o_ref[0] = jnp.sum(h3, axis=1, keepdims=True) * inv_s         # (64, 1)


# ---------------------------------------------------------------------------
# Wrapper
# ---------------------------------------------------------------------------
def _prep_w(w_torch):
    """torch-layout (Cout, Cin, 3) -> (Cout, 3*Cin), column = k*Cin + cin."""
    cout, cin, k = w_torch.shape
    return jnp.transpose(w_torch, (0, 2, 1)).reshape(cout, k * cin)


def feature_extractor_cnn(x, params, *, compute_dtype=jnp.bfloat16):
    """x: (B, S, Cin) float32. Returns (B, 64) float32 (== module.forward)."""
    B, S, Cin = x.shape
    C1, C2, C3 = 16, 32, 64

    # Layout plumbing: present seq-on-lanes tiles to the kernel.
    x_t = jnp.transpose(x, (0, 2, 1))                      # (B, Cin, S)

    w1 = _prep_w(params["w1"]).astype(compute_dtype)
    w2 = _prep_w(params["w2"]).astype(compute_dtype)
    w3 = _prep_w(params["w3"]).astype(compute_dtype)
    b1 = params["b1"].reshape(-1, 1).astype(jnp.float32)
    b2 = params["b2"].reshape(-1, 1).astype(jnp.float32)
    b3 = params["b3"].reshape(-1, 1).astype(jnp.float32)

    const2d = lambda b: (0, 0)   # weights/biases stay resident, no per-step DMA

    flops = 2 * B * S * 3 * (Cin * C1 + C1 * C2 + C2 * C3)
    bytes_accessed = (
        x_t.size * x_t.dtype.itemsize
        + sum(a.size * a.dtype.itemsize for a in (w1, b1, w2, b2, w3, b3))
        + B * C3 * 4)

    kernel = functools.partial(feature_extractor_kernel,
                               compute_dtype=compute_dtype)

    out = pl.pallas_call(
        kernel,
        out_shape=jax.ShapeDtypeStruct((B, C3, 1), jnp.float32),
        grid_spec=pltpu.PrefetchScalarGridSpec(
            num_scalar_prefetch=0,
            grid=(B,),
            in_specs=[
                pl.BlockSpec((1, Cin, S), lambda b: (b, 0, 0)),   # x: per-batch tile
                pl.BlockSpec(w1.shape, const2d),
                pl.BlockSpec(b1.shape, const2d),
                pl.BlockSpec(w2.shape, const2d),
                pl.BlockSpec(b2.shape, const2d),
                pl.BlockSpec(w3.shape, const2d),
                pl.BlockSpec(b3.shape, const2d),
            ],
            out_specs=pl.BlockSpec((1, C3, 1), lambda b: (b, 0, 0)),
        ),
        compiler_params=pltpu.CompilerParams(
            dimension_semantics=("parallel",),          # shard batch across TCs
            vmem_limit_bytes=32 * 1024 * 1024,
        ),
        cost_estimate=pl.CostEstimate(
            flops=flops, transcendentals=0, bytes_accessed=bytes_accessed),
    )(x_t, w1, b1, w2, b2, w3, b3)

    return out[:, :, 0]                                    # (B, 64)


# ---------------------------------------------------------------------------
# Params (PyTorch Conv1d default init, torch weight layout (Cout, Cin, k))
# ---------------------------------------------------------------------------
def init_params(key, input_channels):
    def conv_init(k, cin, cout, ksize=3):
        kw, kb = jax.random.split(k)
        bound = 1.0 / math.sqrt(cin * ksize)
        w = jax.random.uniform(kw, (cout, cin, ksize), jnp.float32, -bound, bound)
        b = jax.random.uniform(kb, (cout,), jnp.float32, -bound, bound)
        return w, b

    k1, k2, k3 = jax.random.split(key, 3)
    w1, b1 = conv_init(k1, input_channels, 16)
    w2, b2 = conv_init(k2, 16, 32)
    w3, b3 = conv_init(k3, 32, 64)
    return {"w1": w1, "b1": b1, "w2": w2, "b2": b2, "w3": w3, "b3": b3}


# ---------------------------------------------------------------------------
# Pure-JAX reference (mirrors the torch module: NCL convs + ReLU + mean)
# ---------------------------------------------------------------------------
def _reference(x, params):
    h = jnp.transpose(x, (0, 2, 1))                        # (B, Cin, S)

    def conv(h, w, b):
        y = lax.conv_general_dilated(
            h, w, window_strides=(1,), padding=[(1, 1)],
            dimension_numbers=("NCH", "OIH", "NCH"))
        y = y + b.reshape(1, -1, 1)
        return jnp.maximum(y, 0.0)

    h = conv(h, params["w1"], params["b1"])
    h = conv(h, params["w2"], params["b2"])
    h = conv(h, params["w3"], params["b3"])
    return jnp.mean(h, axis=2)                             # (B, 64)


if __name__ == "__main__":
    key = jax.random.PRNGKey(0)
    kx, kp = jax.random.split(key)

    B, S, Cin = 2, 8, 4
    x = jax.random.normal(kx, (B, S, Cin), dtype=jnp.float32)
    params = init_params(kp, Cin)

    ref = jax.block_until_ready(_reference(x, params))

    # f32 MXU path: bit-tight check of the kernel math.
    out_f32 = jax.block_until_ready(
        feature_extractor_cnn(x, params, compute_dtype=jnp.float32))
    assert out_f32.shape == (B, 64)
    assert jnp.allclose(out_f32, ref, rtol=1e-4, atol=1e-4), "f32 mismatch"

    # bf16 MXU path (default, for v6e/v7x throughput): looser tolerance.
    out_bf16 = jax.block_until_ready(feature_extractor_cnn(x, params))
    assert out_bf16.shape == (B, 64)
    assert jnp.allclose(out_bf16, ref, rtol=5e-2, atol=5e-2), "bf16 mismatch"

    print("KERNEL_OK")
</pallas_src>

<mosaic_0001>
module attributes {stable_mosaic.version = 11 : i64} {
  func.func @feature_extractor_kernel(%arg0: i32, %arg1: memref<1x4x8xf32, #tpu.memory_space<vmem>>, %arg2: memref<16x12xf32, #tpu.memory_space<vmem>>, %arg3: memref<16x1xf32, #tpu.memory_space<vmem>>, %arg4: memref<32x48xf32, #tpu.memory_space<vmem>>, %arg5: memref<32x1xf32, #tpu.memory_space<vmem>>, %arg6: memref<64x96xf32, #tpu.memory_space<vmem>>, %arg7: memref<64x1xf32, #tpu.memory_space<vmem>>, %arg8: memref<1x64x1xf32, #tpu.memory_space<vmem>>) attributes {dimension_semantics = [#tpu.dimension_semantics<parallel>], iteration_bounds = array<i64: 2>, scalar_prefetch = 0 : i64, scratch_operands = 0 : i64, tpu.core_type = #tpu.core_type<tc>, window_params = [{transform_indices = @transform_0, window_bounds = array<i64: 1, 4, 8>}, {pipeline_mode = #tpu.pipeline_mode<synchronous>, transform_indices = @transform_1, window_bounds = array<i64: 16, 12>}, {pipeline_mode = #tpu.pipeline_mode<synchronous>, transform_indices = @transform_2, window_bounds = array<i64: 16, 1>}, {pipeline_mode = #tpu.pipeline_mode<synchronous>, transform_indices = @transform_3, window_bounds = array<i64: 32, 48>}, {pipeline_mode = #tpu.pipeline_mode<synchronous>, transform_indices = @transform_4, window_bounds = array<i64: 32, 1>}, {pipeline_mode = #tpu.pipeline_mode<synchronous>, transform_indices = @transform_5, window_bounds = array<i64: 64, 96>}, {pipeline_mode = #tpu.pipeline_mode<synchronous>, transform_indices = @transform_6, window_bounds = array<i64: 64, 1>}, {transform_indices = @transform_7, window_bounds = array<i64: 1, 64, 1>}]} {
    %c0 = arith.constant 0 : index
    %c0_0 = arith.constant 0 : index
    %c0_1 = arith.constant 0 : index
    %0 = vector.load %arg1[%c0, %c0_0, %c0_1] : memref<1x4x8xf32, #tpu.memory_space<vmem>>, vector<1x4x8xf32>
    %1 = vector.shape_cast %0 : vector<1x4x8xf32> to vector<4x8xf32>
    %cst = arith.constant 0.000000e+00 : f32
    %2 = vector.broadcast %cst : f32 to vector<4x1xf32>
    %3 = tpu.concatenate %2, %1, %2 in 1 : vector<4x1xf32>, vector<4x8xf32>, vector<4x1xf32> -> vector<4x10xf32>
    %4 = vector.extract_strided_slice %3 {offsets = [0, 0], sizes = [4, 8], strides = [1, 1]} : vector<4x10xf32> to vector<4x8xf32>
    %5 = vector.extract_strided_slice %3 {offsets = [0, 2], sizes = [4, 8], strides = [1, 1]} : vector<4x10xf32> to vector<4x8xf32>
    %6 = tpu.concatenate %4, %1, %5 in 0 : vector<4x8xf32>, vector<4x8xf32>, vector<4x8xf32> -> vector<12x8xf32>
    %c0_2 = arith.constant 0 : index
    %c0_3 = arith.constant 0 : index
    %7 = vector.load %arg2[%c0_2, %c0_3] : memref<16x12xf32, #tpu.memory_space<vmem>>, vector<16x12xf32>
    %cst_4 = arith.constant dense<0.000000e+00> : vector<16x8xf32>
    %8 = tpu.matmul %7, %6, %cst_4 {dimension_numbers = #tpu.dot_dimension_numbers<[1], [0], [0], [1], [0, 0, 1, 1], [], []>} : vector<16x12xf32>, vector<12x8xf32>, vector<16x8xf32> -> vector<16x8xf32>
    %c0_5 = arith.constant 0 : index
    %c0_6 = arith.constant 0 : index
    %9 = vector.load %arg3[%c0_5, %c0_6] : memref<16x1xf32, #tpu.memory_space<vmem>>, vector<16x1xf32>
    %10 = vector.broadcast %9 : vector<16x1xf32> to vector<16x8xf32>
    %11 = arith.addf %8, %10 : vector<16x8xf32>
    %cst_7 = arith.constant 0.000000e+00 : f32
    %12 = vector.broadcast %cst_7 : f32 to vector<16x8xf32>
    %13 = arith.maximumf %11, %12 : vector<16x8xf32>
    %cst_8 = arith.constant 0.000000e+00 : f32
    %14 = vector.broadcast %cst_8 : f32 to vector<16x1xf32>
    %15 = tpu.concatenate %14, %13, %14 in 1 : vector<16x1xf32>, vector<16x8xf32>, vector<16x1xf32> -> vector<16x10xf32>
    %16 = vector.extract_strided_slice %15 {offsets = [0, 0], sizes = [16, 8], strides = [1, 1]} : vector<16x10xf32> to vector<16x8xf32>
    %17 = vector.extract_strided_slice %15 {offsets = [0, 2], sizes = [16, 8], strides = [1, 1]} : vector<16x10xf32> to vector<16x8xf32>
    %18 = tpu.concatenate %16, %13, %17 in 0 : vector<16x8xf32>, vector<16x8xf32>, vector<16x8xf32> -> vector<48x8xf32>
    %c0_9 = arith.constant 0 : index
    %c0_10 = arith.constant 0 : index
    %19 = vector.load %arg4[%c0_9, %c0_10] : memref<32x48xf32, #tpu.memory_space<vmem>>, vector<32x48xf32>
    %cst_11 = arith.constant dense<0.000000e+00> : vector<32x8xf32>
    %20 = tpu.matmul %19, %18, %cst_11 {dimension_numbers = #tpu.dot_dimension_numbers<[1], [0], [0], [1], [0, 0, 1, 1], [], []>} : vector<32x48xf32>, vector<48x8xf32>, vector<32x8xf32> -> vector<32x8xf32>
    %c0_12 = arith.constant 0 : index
    %c0_13 = arith.constant 0 : index
    %21 = vector.load %arg5[%c0_12, %c0_13] : memref<32x1xf32, #tpu.memory_space<vmem>>, vector<32x1xf32>
    %22 = vector.broadcast %21 : vector<32x1xf32> to vector<32x8xf32>
    %23 = arith.addf %20, %22 : vector<32x8xf32>
    %cst_14 = arith.constant 0.000000e+00 : f32
    %24 = vector.broadcast %cst_14 : f32 to vector<32x8xf32>
    %25 = arith.maximumf %23, %24 : vector<32x8xf32>
    %cst_15 = arith.constant 0.000000e+00 : f32
    %26 = vector.broadcast %cst_15 : f32 to vector<32x1xf32>
    %27 = tpu.concatenate %26, %25, %26 in 1 : vector<32x1xf32>, vector<32x8xf32>, vector<32x1xf32> -> vector<32x10xf32>
    %28 = vector.extract_strided_slice %27 {offsets = [0, 0], sizes = [32, 8], strides = [1, 1]} : vector<32x10xf32> to vector<32x8xf32>
    %29 = vector.extract_strided_slice %27 {offsets = [0, 2], sizes = [32, 8], strides = [1, 1]} : vector<32x10xf32> to vector<32x8xf32>
    %30 = tpu.concatenate %28, %25, %29 in 0 : vector<32x8xf32>, vector<32x8xf32>, vector<32x8xf32> -> vector<96x8xf32>
    %c0_16 = arith.constant 0 : index
    %c0_17 = arith.constant 0 : index
    %31 = vector.load %arg6[%c0_16, %c0_17] : memref<64x96xf32, #tpu.memory_space<vmem>>, vector<64x96xf32>
    %cst_18 = arith.constant dense<0.000000e+00> : vector<64x8xf32>
    %32 = tpu.matmul %31, %30, %cst_18 {dimension_numbers = #tpu.dot_dimension_numbers<[1], [0], [0], [1], [0, 0, 1, 1], [], []>} : vector<64x96xf32>, vector<96x8xf32>, vector<64x8xf32> -> vector<64x8xf32>
    %c0_19 = arith.constant 0 : index
    %c0_20 = arith.constant 0 : index
    %33 = vector.load %arg7[%c0_19, %c0_20] : memref<64x1xf32, #tpu.memory_space<vmem>>, vector<64x1xf32>
    %34 = vector.broadcast %33 : vector<64x1xf32> to vector<64x8xf32>
    %35 = arith.addf %32, %34 : vector<64x8xf32>
    %cst_21 = arith.constant 0.000000e+00 : f32
    %36 = vector.broadcast %cst_21 : f32 to vector<64x8xf32>
    %37 = arith.maximumf %35, %36 : vector<64x8xf32>
    %cst_22 = arith.constant dense<0.000000e+00> : vector<64xf32>
    %38 = vector.multi_reduction <add>, %37, %cst_22 [1] : vector<64x8xf32> to vector<64xf32>
    %39 = vector.shape_cast %38 : vector<64xf32> to vector<64x1xf32>
    %cst_23 = arith.constant 1.250000e-01 : f32
    %40 = vector.broadcast %cst_23 : f32 to vector<64x1xf32>
    %41 = arith.mulf %39, %40 : vector<64x1xf32>
    %c0_24 = arith.constant 0 : index
    %c0_25 = arith.constant 0 : index
    %c0_26 = arith.constant 0 : index
    %42 = vector.load %arg8[%c0_24, %c0_25, %c0_26] : memref<1x64x1xf32, #tpu.memory_space<vmem>>, vector<1x64x1xf32>
    %43 = vector.shape_cast %42 : vector<1x64x1xf32> to vector<64x1xf32>
    %44 = vector.shape_cast %41 : vector<64x1xf32> to vector<1x64x1xf32>
    tpu.vector_store %arg8[%c0_24, %c0_25, %c0_26], %44 {strides = array<i32>} : memref<1x64x1xf32, #tpu.memory_space<vmem>>, vector<1x64x1xf32>,
    return
  }
  func.func @transform_0(%arg0: i32) -> (i32, i32, i32) {
    %c0_i32 = arith.constant 0 : i32
    %c0_i32_0 = arith.constant 0 : i32
    %c0_i32_1 = arith.constant 0 : i32
    return %arg0, %c0_i32, %c0_i32_0 : i32, i32, i32
  }
  func.func @transform_1(%arg0: i32) -> (i32, i32) {
    %c0_i32 = arith.constant 0 : i32
    %c0_i32_0 = arith.constant 0 : i32
    %c0_i32_1 = arith.constant 0 : i32
    return %c0_i32, %c0_i32_0 : i32, i32
  }
  func.func @transform_2(%arg0: i32) -> (i32, i32) {
    %c0_i32 = arith.constant 0 : i32
    %c0_i32_0 = arith.constant 0 : i32
    %c0_i32_1 = arith.constant 0 : i32
    return %c0_i32, %c0_i32_0 : i32, i32
  }
  func.func @transform_3(%arg0: i32) -> (i32, i32) {
    %c0_i32 = arith.constant 0 : i32
    %c0_i32_0 = arith.constant 0 : i32
    %c0_i32_1 = arith.constant 0 : i32
    return %c0_i32, %c0_i32_0 : i32, i32
  }
  func.func @transform_4(%arg0: i32) -> (i32, i32) {
    %c0_i32 = arith.constant 0 : i32
    %c0_i32_0 = arith.constant 0 : i32
    %c0_i32_1 = arith.constant 0 : i32
    return %c0_i32, %c0_i32_0 : i32, i32
  }
  func.func @transform_5(%arg0: i32) -> (i32, i32) {
    %c0_i32 = arith.constant 0 : i32
    %c0_i32_0 = arith.constant 0 : i32
    %c0_i32_1 = arith.constant 0 : i32
    return %c0_i32, %c0_i32_0 : i32, i32
  }
  func.func @transform_6(%arg0: i32) -> (i32, i32) {
    %c0_i32 = arith.constant 0 : i32
    %c0_i32_0 = arith.constant 0 : i32
    %c0_i32_1 = arith.constant 0 : i32
    return %c0_i32, %c0_i32_0 : i32, i32
  }
  func.func @transform_7(%arg0: i32) -> (i32, i32, i32) {
    %c0_i32 = arith.constant 0 : i32
    %c0_i32_0 = arith.constant 0 : i32
    %c0_i32_1 = arith.constant 0 : i32
    return %arg0, %c0_i32, %c0_i32_0 : i32, i32, i32
  }
}

</mosaic_0001>

<bundles_post_ra>
// kernel: tpu_custom_call.1
= control target key start
LH: loop header
LB: loop body
LE: loop exit
PB: predicated region body
PF: predicated region fallthrough
CT: control target
= control target key end

     0   :  { %s1063_s24 = smov 0   ;;  %s1238_s0 = inlined_call_operand.vmem [shape: f32[2,4,8], index: 0, kind: input, shape index: {}]   ;;  %s1239_s1 = inlined_call_operand.vmem [shape: f32[16,12], index: 1, kind: input, shape index: {}]   ;;  %s1240_s2 = inlined_call_operand.vmem [shape: f32[16,1], index: 2, kind: input, shape index: {}]   ;;  %s1241_s3 = inlined_call_operand.vmem [shape: f32[32,48], index: 3, kind: input, shape index: {}]   ;;  %s1242_s4 = inlined_call_operand.vmem [shape: f32[32,1], index: 4, kind: input, shape index: {}]   ;;  %s1243_s5 = inlined_call_operand.vmem [shape: f32[64,96], index: 5, kind: input, shape index: {}]   ;;  %s1244_s6 = inlined_call_operand.vmem [shape: f32[64,1], index: 6, kind: input, shape index: {}]   ;;  %s1245_s7 = inlined_call_operand.vmem [shape: f32[2,64,1], index: 7, kind: output, shape index: {}]  }
   0x1 LB: > { %s872_s25 = sadd.s32 4294967295, %s1018_s24   ;;  %p876_p0 = scmp.ge.s32.totalorder %s1018_s24, 1  ;;  %s1018_s24 = sphi %s1063_s24, %s17_s24  }
   0x2   : > { %p236_p1 = scmp.lt.s32.totalorder %s1018_s24, 3 }
   0x4   : > { %p237_p2 = pnand %p876_p0, %p236_p1 }
   0x5   : > { %p267_p3 = scmp.lt.s32.totalorder (!%p237_p2), %s872_s25, 1  ;;  %s1020_s30 = smov (!%p237_p2), 1  }
   0x6   : > { %240 = sbr.rel (%p237_p2) target bundleno = 1502 (0x5de), region = 48  ;;  %s1022_s14 = smov (!%p237_p2), 126  }
   0xb   : > { %s1247_s25 = smov (!%p267_p3, %s872_s25), 1  ;;  %v292_v1 = vld [vmem:[%s1239_s1] sm:$0xff]  ;;  %vm306_vm0 = vcmask 97280   ;;  %v295_v2 = vld [vmem:[%s1240_s2 + $0x8] sm:$0xff]  ;;  %v1021_v3 = vmov 0   ;;  %vm281_vm1 = vcmask 7168  }
   0xc   : > { %s877_s26 = sshll.u32 %s1247_s25, 2  ;;  %942 = vmatprep.mubr.msk.f32.mxu1 %vm306_vm0, %v292_v1  ;;  %1010 = vset.pattern.permute.xlu1 %v1021_v3  ;;  %v294_v4 = vld [vmem:[%s1240_s2] sm:$0xff]  ;;  %vm283_vm2 = vcmask 72704   ;;  %vm290_vm3 = vcmask 1043456   ;;  %v293_v11 = vld [vmem:[%s1239_s1 + $0x8] sm:$0xff]  ;;  %vm440_vm4 = vcmask 392192  }
   0xd   : > { %s270_s29 = scalar_lea.vmem %s1238_s0, %s877_s26  ;;  %1011 = vset.pattern.permute.xlu0 %v1021_v3  ;;  %303 = vperm.xlu1 %1010, %v295_v2   ;;  %v412_v21 = vld [vmem:[%s1241_s3] sm:$0xff]  ;;  %v418_v27 = vld [vmem:[%s1242_s4 + $0x10] sm:$0xff]  ;;  %v419_v28 = vld [vmem:[%s1242_s4 + $0x18] sm:$0xff]  ;;  %vm638_vm5 = vcmask 785408   ;;  %vm776_vm6 = vcmask 64512   ;;  %s903_s23 = sshll.u32 %s1247_s25, 6 }
   0xe   : > { %v276_v0 = vld [vmem:[%s270_s29] sm:$0xf]  ;;  %v417_v29 = vld [vmem:[%s1242_s4 + $0x8] sm:$0xff]  ;;  %v414_v34 = vld [vmem:[%s1241_s3 + $0x10] sm:$0xff]  ;;  %s275_s28 = scalar_lea.vmem %s1245_s7, %s903_s23 }
   0xf   : > { %278 = vrot.lane.b32.xlu0 %v276_v0, %s1020_s30  ;;  %v285_v5 = vrot.slane %v276_v0, 4  ;;  %v416_v30 = vld [vmem:[%s1242_s4] sm:$0xff]  ;;  %v413_v33 = vld [vmem:[%s1241_s3 + $0x8] sm:$0xff]  ;;  %v415_v35 = vld [vmem:[%s1241_s3 + $0x18] sm:$0xff] }
  0x10   : > { %v590_v0 = vld [vmem:[%s1244_s6] sm:$0xff]  ;;  %v591_v1 = vld [vmem:[%s1244_s6 + $0x8] sm:$0xff]  ;;  %v592_v2 = vld [vmem:[%s1244_s6 + $0x10] sm:$0xff] }
  0x11   : > { %298 = vperm.xlu1 %1010, %v294_v4   ;;  %v582_v3 = vld [vmem:[%s1243_s5] sm:$0xff]  ;;  %v593_v4 = vld [vmem:[%s1244_s6 + $0x18] sm:$0xff] }
  0x12   : > { %987 = vmatprep.mubr.msk.f32.mxu0 %vm638_vm5, %v582_v3 }
  0x81   : > { %v279_v6 = vpop.permute.xlu0 %278 }
  0x82   : > { %v282_v7 = vsel %vm281_vm1, 0.0, %v279_v6  ;;  %v595_v6 = vld [vmem:[%s1244_s6 + $0x28] sm:$0xff] }
  0x83   : > { %v284_v8 = vsel %vm283_vm2, %v282_v7, 0.0  ;;  %v596_v7 = vld [vmem:[%s1244_s6 + $0x30] sm:$0xff] }
  0x84   : > { %288 = vrot.lane.b32.xlu0 %v284_v8, %s1022_s14  ;;  %v291_v9 = vsel %vm290_vm3, %v284_v8, %v285_v5  ;;  %v594_v5 = vld [vmem:[%s1244_s6 + $0x20] sm:$0xff]  ;;  %v597_v8 = vld [vmem:[%s1244_s6 + $0x38] sm:$0xff] }
  0x88   : > { %v304_v12 = vpop.permute.xlu1 %303 }
  0x8c   : > { %v299_v15 = vpop.permute.xlu1 %298 }
  0xf6   : > { %v289_v10 = vpop.permute.xlu0 %288 }
  0xf7   : > { %938 = vmatprep.subr.msk.mxu1 %vm290_vm3, %v289_v10 }
  0xf8   : > { %939 = vmatpush3.msk.msra.mxu1 %vm290_vm3, %v289_v10 }
  0xf9   : > { %940 = vmatprep.subr.mxu1 %v291_v9 }
  0xfa   : > { %941 = vmatpush3.msra.mxu1 %v291_v9 }
  0xfb   : > { %943 = vmatmul.mubr.msk.f32.vlgmr.msra.gmra.mxu1 %vm306_vm0, %v293_v11 }
  0xfc   : > { %957 = vmatprep.mubr.msk.f32.mxu1 %vm440_vm4, %v412_v21 }
 0x1bb   : > { %v944_v13 = vpop.f32.mrf.mxu1 }
 0x1bc   : > { %v387_v14 = vadd.f32 %v944_v13, %v304_v12  ;;  %v583_v13 = vld [vmem:[%s1243_s5 + $0x8] sm:$0xff] }
 0x1bd   : > { %v381_v16 = vpop.f32.mrf.mxu1 }
 0x1be   : > { %v391_v17 = vmax.f32 %v387_v14, 0.0  ;;  %v382_v18 = vadd.f32 %v381_v16, %v299_v15  ;;  %v584_v14 = vld [vmem:[%s1243_s5 + $0x10] sm:$0xff]  ;;  %v585_v15 = vld [vmem:[%s1243_s5 + $0x18] sm:$0xff]  ;;  %v586_v16 = vld [vmem:[%s1243_s5 + $0x20] sm:$0xff] }
 0x1c0   : > { %v390_v19 = vmax.f32 %v382_v18, 0.0  ;;  %396 = vrot.lane.b32.xlu0 %v391_v17, %s1020_s30  ;;  %v588_v18 = vld [vmem:[%s1243_s5 + $0x30] sm:$0xff] }
 0x1c2   : > { %394 = vrot.lane.b32.xlu1 %v390_v19, %s1020_s30 }
 0x232   : > { %v397_v20 = vpop.permute.xlu0 %396 }
 0x233   : > { %v401_v22 = vsel %vm281_vm1, 0.0, %v397_v20 }
 0x234   : > { %v395_v23 = vpop.permute.xlu1 %394  ;;  %v403_v24 = vsel %vm283_vm2, %v401_v22, 0.0 }
 0x235   : > { %v400_v25 = vsel %vm281_vm1, 0.0, %v395_v23  ;;  %408 = vrot.lane.b32.xlu0 %v403_v24, %s1022_s14 }
 0x236   : > { %v402_v26 = vsel %vm283_vm2, %v400_v25, 0.0 }
 0x237   : > { %406 = vrot.lane.b32.xlu1 %v402_v26, %s1022_s14 }
 0x239   : > { %437 = vperm.xlu0 %1011, %v419_v28  }
 0x23b   : > { %432 = vperm.xlu1 %1010, %v418_v27  }
 0x23d   : > { %422 = vperm.xlu0 %1011, %v416_v30  }
 0x23f   : > { %427 = vperm.xlu1 %1010, %v417_v29  }
 0x2a7   : > { %v409_v31 = vpop.permute.xlu0 %408 }
 0x2a8   : > { %945 = vmatprep.subr.mxu1 %v409_v31 }
 0x2a9   : > { %946 = vmatpush3.msra.mxu1 %v409_v31  ;;  %v407_v32 = vpop.permute.xlu1 %406 }
 0x2aa   : > { %947 = vmatprep.subr.mxu1 %v407_v32 }
 0x2ab   : > { %948 = vmatpush3.msra.mxu1 %v407_v32 }
 0x2ac   : > { %949 = vmatprep.subr.mxu1 %v391_v17 }
 0x2ad   : > { %950 = vmatpush3.msra.mxu1 %v391_v17  ;;  %v587_v17 = vld [vmem:[%s1243_s5 + $0x28] sm:$0xff] }
 0x2ae   : > { %951 = vmatprep.subr.mxu1 %v390_v19 }
 0x2af   : > { %952 = vmatpush3.msra.mxu1 %v390_v19  ;;  %v589_v19 = vld [vmem:[%s1243_s5 + $0x38] sm:$0xff] }
 0x2b0   : > { %953 = vmatprep.subr.msk.mxu1 %vm283_vm2, %v401_v22 }
 0x2b1   : > { %954 = vmatpush3.msk.msra.mxu1 %vm283_vm2, %v401_v22 }
 0x2b2   : > { %955 = vmatprep.subr.msk.mxu1 %vm283_vm2, %v400_v25 }
 0x2b3   : > { %956 = vmatpush3.msk.msra.mxu1 %vm283_vm2, %v400_v25 }
 0x2b4   : > { %958 = vmatmul.mubr.msk.f32.vlgmr.msra.gmra.mxu1 %vm440_vm4, %v413_v33  ;;  %v438_v37 = vpop.permute.xlu0 %437 }
 0x2b5   : > { %960 = vmatprep.mubr.msk.f32.mxu1 %vm440_vm4, %v414_v34 }
 0x2b6   : > { %v433_v36 = vpop.permute.xlu1 %432 }
 0x2b8   : > { %961 = vmatmul.mubr.msk.f32.gmra.mxu1 %vm440_vm4, %v415_v35  ;;  %v423_v43 = vpop.permute.xlu0 %422 }
 0x2ba   : > { %v428_v41 = vpop.permute.xlu1 %427 }
 0x374   : > { %v959_v38 = vpop.f32.mrf.mxu1 }
 0x375   : > { %v525_v45 = vadd.f32 %v959_v38, %v428_v41 }
 0x376   : > { %v519_v39 = vpop.f32.mrf.mxu1 }
 0x377   : > { %v520_v48 = vadd.f32 %v519_v39, %v423_v43  ;;  %v539_v50 = vmax.f32 %v525_v45, 0.0 }
 0x378   : > { %v962_v40 = vpop.f32.mrf.mxu1 }
 0x379   : > { %v535_v42 = vadd.f32 %v962_v40, %v438_v37  ;;  %v538_v51 = vmax.f32 %v520_v48, 0.0 }
 0x37a   : > { %v529_v44 = vpop.f32.mrf.mxu1 }
 0x37b   : > { %v541_v46 = vmax.f32 %v535_v42, 0.0  ;;  %v530_v47 = vadd.f32 %v529_v44, %v433_v36 }
 0x37d   : > { %v540_v49 = vmax.f32 %v530_v47, 0.0  ;;  %552 = vrot.lane.b32.xlu1 %v541_v46, %s1020_s30 }
 0x37f   : > { %550 = vrot.lane.b32.xlu0 %v540_v49, %s1020_s30 }
 0x381   : > { %548 = vrot.lane.b32.xlu1 %v539_v50, %s1020_s30 }
 0x383   : > { %546 = vrot.lane.b32.xlu0 %v538_v51, %s1020_s30 }
 0x3ef   : > { %v553_v52 = vpop.permute.xlu1 %552 }
 0x3f0   : > { %v561_v53 = vsel %vm281_vm1, 0.0, %v553_v52 }
 0x3f1   : > { %v551_v54 = vpop.permute.xlu0 %550  ;;  %v565_v55 = vsel %vm283_vm2, %v561_v53, 0.0 }
 0x3f2   : > { %v560_v56 = vsel %vm281_vm1, 0.0, %v551_v54  ;;  %576 = vrot.lane.b32.xlu1 %v565_v55, %s1022_s14 }
 0x3f3   : > { %v549_v57 = vpop.permute.xlu1 %548  ;;  %v564_v58 = vsel %vm283_vm2, %v560_v56, 0.0 }
 0x3f4   : > { %v559_v59 = vsel %vm281_vm1, 0.0, %v549_v57  ;;  %574 = vrot.lane.b32.xlu0 %v564_v58, %s1022_s14 }
 0x3f5   : > { %v547_v60 = vpop.permute.xlu0 %546  ;;  %v563_v61 = vsel %vm283_vm2, %v559_v59, 0.0 }
 0x3f6   : > { %v558_v62 = vsel %vm281_vm1, 0.0, %v547_v60  ;;  %572 = vrot.lane.b32.xlu1 %v563_v61, %s1022_s14 }
 0x3f7   : > { %v562_v63 = vsel %vm283_vm2, %v558_v62, 0.0 }
 0x3f8   : > { %570 = vrot.lane.b32.xlu0 %v562_v63, %s1022_s14 }
 0x3fa   : > { %600 = vperm.xlu1 %1010, %v590_v0  }
 0x3fc   : > { %605 = vperm.xlu0 %1011, %v591_v1  }
 0x3fe   : > { %610 = vperm.xlu1 %1010, %v592_v2  }
 0x400   : > { %615 = vperm.xlu0 %1011, %v593_v4  }
 0x402   : > { %620 = vperm.xlu1 %1010, %v594_v5  }
 0x404   : > { %625 = vperm.xlu0 %1011, %v595_v6  }
 0x406   : > { %630 = vperm.xlu1 %1010, %v596_v7  }
 0x408   : > { %635 = vperm.xlu0 %1011, %v597_v8  }
 0x464   : > { %v577_v9 = vpop.permute.xlu1 %576 }
 0x465   : > { %963 = vmatprep.subr.mxu0 %v577_v9 }
 0x466   : > { %v575_v10 = vpop.permute.xlu0 %574  ;;  %964 = vmatpush3.msra.mxu0 %v577_v9 }
 0x467   : > { %965 = vmatprep.subr.mxu0 %v575_v10 }
 0x468   : > { %966 = vmatpush3.msra.mxu0 %v575_v10  ;;  %v573_v11 = vpop.permute.xlu1 %572 }
 0x469   : > { %967 = vmatprep.subr.mxu0 %v573_v11 }
 0x46a   : > { %v571_v12 = vpop.permute.xlu0 %570  ;;  %968 = vmatpush3.msra.mxu0 %v573_v11 }
 0x46b   : > { %969 = vmatprep.subr.mxu0 %v571_v12 }
 0x46c   : > { %970 = vmatpush3.msra.mxu0 %v571_v12 }
 0x46d   : > { %971 = vmatprep.subr.mxu0 %v541_v46 }
 0x46e   : > { %972 = vmatpush3.msra.mxu0 %v541_v46 }
 0x46f   : > { %973 = vmatprep.subr.mxu0 %v540_v49 }
 0x470   : > { %974 = vmatpush3.msra.mxu0 %v540_v49 }
 0x471   : > { %975 = vmatprep.subr.mxu0 %v539_v50 }
 0x472   : > { %976 = vmatpush3.msra.mxu0 %v539_v50 }
 0x473   : > { %977 = vmatprep.subr.mxu0 %v538_v51 }
 0x474   : > { %978 = vmatpush3.msra.mxu0 %v538_v51 }
 0x475   : > { %979 = vmatprep.subr.msk.mxu0 %vm283_vm2, %v561_v53  ;;  %v601_v21 = vpop.permute.xlu1 %600 }
 0x476   : > { %980 = vmatpush3.msk.msra.mxu0 %vm283_vm2, %v561_v53 }
 0x477   : > { %981 = vmatprep.subr.msk.mxu0 %vm283_vm2, %v560_v56  ;;  %v606_v20 = vpop.permute.xlu0 %605 }
 0x478   : > { %982 = vmatpush3.msk.msra.mxu0 %vm283_vm2, %v560_v56 }
 0x479   : > { %983 = vmatprep.subr.msk.mxu0 %vm283_vm2, %v559_v59  ;;  %v611_v25 = vpop.permute.xlu1 %610 }
 0x47a   : > { %984 = vmatpush3.msk.msra.mxu0 %vm283_vm2, %v559_v59 }
 0x47b   : > { %985 = vmatprep.subr.msk.mxu0 %vm283_vm2, %v558_v62  ;;  %v616_v22 = vpop.permute.xlu0 %615 }
 0x47c   : > { %986 = vmatpush3.msk.msra.mxu0 %vm283_vm2, %v558_v62 }
 0x47d   : > { %988 = vmatmul.mubr.msk.f32.vlgmr.msra.gmra.mxu0 %vm638_vm5, %v583_v13  ;;  %v621_v38 = vpop.permute.xlu1 %620 }
 0x47e   : > { %990 = vmatprep.mubr.msk.f32.mxu0 %vm638_vm5, %v584_v14 }
 0x47f   : > { %v626_v33 = vpop.permute.xlu0 %625 }
 0x481   : > { %991 = vmatmul.mubr.msk.f32.gmra.mxu0 %vm638_vm5, %v585_v15  ;;  %v631_v51 = vpop.permute.xlu1 %630 }
 0x482   : > { %993 = vmatprep.mubr.msk.f32.mxu0 %vm638_vm5, %v586_v16 }
 0x483   : > { %v636_v47 = vpop.permute.xlu0 %635 }
 0x485   : > { %994 = vmatmul.mubr.msk.f32.gmra.mxu0 %vm638_vm5, %v587_v17 }
 0x486   : > { %996 = vmatprep.mubr.msk.f32.mxu0 %vm638_vm5, %v588_v18 }
 0x489   : > { %997 = vmatmul.mubr.msk.f32.gmra.mxu0 %vm638_vm5, %v589_v19 }
 0x53d   : > { %v989_v23 = vpop.f32.mrf.mxu0 }
 0x53e   : > { %v735_v24 = vadd.f32 %v989_v23, %v606_v20 }
 0x53f   : > { %v729_v26 = vpop.f32.mrf.mxu0 }
 0x540   : > { %v769_v27 = vmax.f32 %v735_v24, 0.0  ;;  %v730_v28 = vadd.f32 %v729_v26, %v601_v21 }
 0x541   : > { %v992_v29 = vpop.f32.mrf.mxu0 }
 0x542   : > { %v768_v30 = vmax.f32 %v730_v28, 0.0  ;;  %v745_v31 = vadd.f32 %v992_v29, %v616_v22  ;;  %v780_v32 = vsel %vm776_vm6, %v769_v27, 0.0 }
 0x543   : > { %781 = vadd.xlane.f32.xlu0 %v780_v32  ;;  %v739_v34 = vpop.f32.mrf.mxu0 }
 0x544   : > { %v771_v35 = vmax.f32 %v745_v31, 0.0  ;;  %v740_v36 = vadd.f32 %v739_v34, %v611_v25  ;;  %v777_v37 = vsel %vm776_vm6, %v768_v30, 0.0 }
 0x545   : > { %v995_v39 = vpop.f32.mrf.mxu0  ;;  %778 = vadd.xlane.f32.xlu1 %v777_v37 }
 0x546   : > { %v770_v40 = vmax.f32 %v740_v36, 0.0  ;;  %v755_v41 = vadd.f32 %v995_v39, %v626_v33  ;;  %v786_v45 = vsel %vm776_vm6, %v771_v35, 0.0 }
 0x547   : > { %v749_v42 = vpop.f32.mrf.mxu0 }
 0x548   : > { %v773_v43 = vmax.f32 %v755_v41, 0.0  ;;  %v750_v44 = vadd.f32 %v749_v42, %v621_v38  ;;  %v783_v46 = vsel %vm776_vm6, %v770_v40, 0.0 }
 0x549   : > { %v998_v48 = vpop.f32.mrf.mxu0  ;;  %787 = vadd.xlane.f32.xlu1 %v786_v45  ;;  %784 = vadd.xlane.f32.xlu0 %v783_v46 }
 0x54a   : > { %v772_v49 = vmax.f32 %v750_v44, 0.0  ;;  %v765_v50 = vadd.f32 %v998_v48, %v636_v47  ;;  %v792_v55 = vsel %vm776_vm6, %v773_v43, 0.0 }
 0x54b   : > { %v759_v52 = vpop.f32.mrf.mxu0 }
 0x54c   : > { %v775_v53 = vmax.f32 %v765_v50, 0.0  ;;  %v760_v54 = vadd.f32 %v759_v52, %v631_v51  ;;  %v789_v56 = vsel %vm776_vm6, %v772_v49, 0.0 }
 0x54d   : > { %793 = vadd.xlane.f32.xlu1 %v792_v55  ;;  %790 = vadd.xlane.f32.xlu0 %v789_v56 }
 0x54e   : > { %v774_v57 = vmax.f32 %v760_v54, 0.0  ;;  %v798_v58 = vsel %vm776_vm6, %v775_v53, 0.0 }
 0x550   : > { %v795_v59 = vsel %vm776_vm6, %v774_v57, 0.0 }
 0x551   : > { %799 = vadd.xlane.f32.xlu1 %v798_v58  ;;  %796 = vadd.xlane.f32.xlu0 %v795_v59 }
 0x5cc   : > { %v782_v60 = vpop.xlane.xlu0 %781 }
 0x5cd   : > { %v802_v61 = vmul.f32 0.125, %v782_v60 }
 0x5ce   : > { %v779_v62 = vpop.xlane.xlu1 %778 }
 0x5cf   : > { %810 = vst.msk [vmem:[%s275_s28 + $0x8] sm:$0xff] %vm281_vm1, %v802_v61  ;;  %v801_v63 = vmul.f32 0.125, %v779_v62 }
 0x5d1   : > { %809 = vst.msk [vmem:[%s275_s28] sm:$0xff] %vm281_vm1, %v801_v63 }
 0x5d2   : > { %v785_v0 = vpop.xlane.xlu0 %784  ;;  %v788_v1 = vpop.xlane.xlu1 %787 }
 0x5d3   : > { %v803_v2 = vmul.f32 0.125, %v785_v0  ;;  %v804_v3 = vmul.f32 0.125, %v788_v1 }
 0x5d5   : > { %811 = vst.msk [vmem:[%s275_s28 + $0x10] sm:$0xff] %vm281_vm1, %v803_v2  ;;  %812 = vst.msk [vmem:[%s275_s28 + $0x18] sm:$0xff] %vm281_vm1, %v804_v3 }
 0x5d6   : > { %v791_v4 = vpop.xlane.xlu0 %790  ;;  %v794_v5 = vpop.xlane.xlu1 %793 }
 0x5d7   : > { %v805_v6 = vmul.f32 0.125, %v791_v4  ;;  %v806_v7 = vmul.f32 0.125, %v794_v5 }
 0x5d9   : > { %813 = vst.msk [vmem:[%s275_s28 + $0x20] sm:$0xff] %vm281_vm1, %v805_v6  ;;  %814 = vst.msk [vmem:[%s275_s28 + $0x28] sm:$0xff] %vm281_vm1, %v806_v7 }
 0x5da   : > { %v797_v8 = vpop.xlane.xlu0 %796  ;;  %v800_v9 = vpop.xlane.xlu1 %799 }
 0x5db   : > { %v807_v10 = vmul.f32 0.125, %v797_v8  ;;  %v808_v11 = vmul.f32 0.125, %v800_v9 }
 0x5dd   : > { %815 = vst.msk [vmem:[%s275_s28 + $0x30] sm:$0xff] %vm281_vm1, %v807_v10  ;;  %816 = vst.msk [vmem:[%s275_s28 + $0x38] sm:$0xff] %vm281_vm1, %v808_v11 }
 0x5de PF: > { %s17_s24 = sadd.s32 1, %s1018_s24  }
 0x5df   : > { %p14_p4 = scmp.ge.s32.totalorder %s17_s24, 4  }
 0x5e1   :  { %16 = sbr.rel (!%p14_p4) target bundleno = 1 (0x1), region = 78 }

</bundles_post_ra>
